<compile_context>
chip_gen: v7x
topology: tpu7x:2x2x1
jax: 0.10.0
libtpu: 0.0.40
codegen_flags: <defaults>
</compile_context>

<pallas_src>
import numpy as np
import jax
import jax.numpy as jnp
from jax.experimental import pallas as pl
from jax.experimental.pallas import tpu as pltpu


def _to2(v):
    return (v, v) if isinstance(v, int) else tuple(v)


def _ceil_to(v, m):
    return -(-v // m) * m


def _padded_block_bytes(shape, dtype):
    """Upper bound of VMEM bytes for one block (lane->128, sublane->8)."""
    s = list(shape)
    s[-1] = _ceil_to(s[-1], 128)
    if len(s) >= 2:
        s[-2] = _ceil_to(s[-2], 8)
    n = 1
    for d in s:
        n *= d
    return n * np.dtype(dtype).itemsize


def _make_conv_stats_kernel(Dh, Dw, tho, Wo, Cs, E):
    """Space-to-depth conv (Dh*Dw dots, K=Cs each) + packed BN partial stats.

    Writes the conv result already transposed as (E, tm) so kernel 2 is a pure
    lane-dense streaming kernel.
    """
    tm = tho * Wo

    def kernel(x_ref, w_ref, y_ref, st_ref):
        acc = jnp.zeros((tm, E), jnp.float32)
        for dh in range(Dh):
            for dw in range(Dw):
                # (tho, Wo, Cs) static slice of the halo'd space-to-depth tile
                slab = x_ref[0, dh:dh + tho, dw:dw + Wo, :]
                slab = slab.reshape(tm, Cs)
                acc = acc + jnp.dot(slab, w_ref[dh * Dw + dw],
                                    preferred_element_type=jnp.float32)
        # per-tile BatchNorm partial stats (f32, from the f32 accumulator)
        mu = jnp.mean(acc, axis=0, keepdims=True)              # (1, E)
        sq = jnp.sum((acc - mu) ** 2, axis=0, keepdims=True)   # (1, E)
        st_ref[0] = jnp.concatenate([mu, sq], axis=0)          # (2, E), one DMA
        # transpose here (XLU slack in the matmul kernel); bf16 handoff halves
        # the intermediate HBM traffic, stats stay f32.
        y_ref[0] = acc.T.astype(y_ref.dtype)                   # (E, tm)

    return kernel


def _bn_relu_kernel(y_ref, scale_ref, shift_ref, o_ref):
    # upcast right after load: bf16 is storage-only on the HBM path (v5e-safe)
    y = y_ref[0].astype(jnp.float32)                           # (E, tm)
    z = jnp.maximum(y * scale_ref[...] + shift_ref[...], 0.0)  # (E,1) lane-bcast
    o_ref[0] = z.astype(o_ref.dtype)                           # lane-dense store


def patch_embed_overlapping(x, w, b, gamma, beta, *, patch_size, stride, padding,
                            eps=1e-5, target_tm=1024,
                            compute_dtype=jnp.bfloat16,
                            intermediate_dtype=jnp.bfloat16):
    """Conv2d(patch, stride, pad) + BatchNorm2d(train batch stats) + ReLU -> NCHW.

    `b` (conv bias) is accepted for API parity but cancels exactly under
    train-mode BatchNorm, so it never enters the kernels.  groups == 1 only.
    """
    N, C, H, W = x.shape
    E = w.shape[0]
    kh, kw = _to2(patch_size)
    sh, sw = _to2(stride)
    ph, pw = _to2(padding)

    Ho = (H + 2 * ph - kh) // sh + 1
    Wo = (W + 2 * pw - kw) // sw + 1
    dh_max = (kh - 1) // sh
    dw_max = (kw - 1) // sw
    Dh, Dw = dh_max + 1, dw_max + 1      # displacement taps (usually 2x2)
    A = Ho + dh_max                      # H extent of the space-to-depth image
    Bq = Wo + dw_max                     # W extent of the space-to-depth image
    Hp2, Wp2 = A * sh, Bq * sw           # padded image extents, phase-aligned
    Cs = sh * sw * C                     # space-to-depth channel depth

    in_itm = np.dtype(compute_dtype).itemsize
    y_itm = np.dtype(intermediate_dtype).itemsize

    # ---- tile selection: tho output rows x full Wo per grid step.
    # tm = tho*Wo must be a multiple of 128 (unmasked, lane-dense output
    # stores) unless the tile covers the whole image (n_t == 1).
    def step_bytes(d):
        tm_ = d * Wo
        bx = (d + dh_max) * _ceil_to(Bq, 8) * _ceil_to(Cs, 128) * in_itm
        by = _ceil_to(E, 8) * _ceil_to(tm_, 128) * y_itm
        ba = _ceil_to(tm_, 8) * _ceil_to(E, 128) * 4
        return 2 * bx + 2 * by + 2 * ba

    cands = [d for d in range(1, Ho + 1)
             if Ho % d == 0 and (d == Ho or (d * Wo) % 128 == 0)]
    fit = [d for d in cands
           if d * Wo <= max(target_tm, Wo) and step_bytes(d) <= (24 << 20)]
    tho = max(fit) if fit else min(cands)
    # TODO(synk): support a masked remainder tile (with a count-weighted
    # variance combine) so tho does not have to divide Ho exactly.
    n_t = Ho // tho
    tm = tho * Wo
    A2 = tho + dh_max                    # per-tile rows incl. halo
    NT = N * n_t
    M = NT * tm                          # == N * Ho * Wo

    # ---- wrapper-side layout prep: single bf16 pass over an input-sized tensor
    xb = x.astype(compute_dtype)
    pad_b = max(0, Hp2 - ph - H)
    pad_r = max(0, Wp2 - pw - W)
    xp = jnp.pad(xb, ((0, 0), (0, 0), (ph, pad_b), (pw, pad_r)))[:, :, :Hp2, :Wp2]
    # NCHW -> NHWC -> stride-phase space-to-depth (lane dim = Cs, not C)
    xs2d = (xp.transpose(0, 2, 3, 1)
              .reshape(N, A, sh, Bq, sw, C)
              .transpose(0, 1, 3, 2, 4, 5)
              .reshape(N, A, Bq, Cs))
    if n_t == 1:
        xt = xs2d.reshape(NT, A2, Bq, Cs)          # A2 == A, no halo duplication
    else:
        # overlapping A2-row windows (only dh_max halo rows duplicated per tile)
        # TODO(synk): express this window via pl.Element offsets in the x
        # BlockSpec index_map instead of materializing the halo'd tiles in HBM.
        xt = jnp.stack([xs2d[:, t * tho: t * tho + A2] for t in range(n_t)],
                       axis=1).reshape(NT, A2, Bq, Cs)

    # conv weight regrouped to match the space-to-depth channel packing:
    # w_s2d[dh*Dw+dw, (p*sw+q)*C + c, e] = w[e, c, dh*sh+p, dw*sw+q] (0 if OOB)
    w_pad = jnp.pad(w, ((0, 0), (0, 0), (0, Dh * sh - kh), (0, Dw * sw - kw)))
    w_s2d = (w_pad.reshape(E, C, Dh, sh, Dw, sw)
                  .transpose(2, 4, 3, 5, 1, 0)
                  .reshape(Dh * Dw, Cs, E)
                  .astype(compute_dtype))

    x_block = (1, A2, Bq, Cs)
    w_block = (Dh * Dw, Cs, E)

    # ---- VMEM budget from the (double-buffered) block sizes, v7x-safe ----
    est1 = (2 * (_padded_block_bytes(x_block, compute_dtype)
                 + _padded_block_bytes((1, E, tm), intermediate_dtype)
                 + _padded_block_bytes((1, 2, E), jnp.float32)
                 + _padded_block_bytes(w_block, compute_dtype))
            + 2 * _padded_block_bytes((tm, E), jnp.float32))   # acc + transpose tmp
    est2 = 2 * (_padded_block_bytes((1, E, tm), intermediate_dtype)
                + _padded_block_bytes((1, E, tm), jnp.float32)
                + 2 * _padded_block_bytes((E, 1), jnp.float32))
    need = max(est1, est2)
    vmem_limit = int(min(max(2 * need, 16 << 20), 40 << 20))   # v7x: 64 MiB phys
    vmem_limit = int(min(max(vmem_limit, need + (2 << 20)), 56 << 20))

    # ---- kernel 1: space-to-depth conv matmuls + packed BN partial stats ----
    y, stats = pl.pallas_call(
        _make_conv_stats_kernel(Dh, Dw, tho, Wo, Cs, E),
        out_shape=(jax.ShapeDtypeStruct((NT, E, tm), intermediate_dtype),
                   jax.ShapeDtypeStruct((NT, 2, E), jnp.float32)),
        grid_spec=pltpu.PrefetchScalarGridSpec(
            num_scalar_prefetch=0,
            grid=(NT,),
            in_specs=[pl.BlockSpec(x_block, lambda i: (i, 0, 0, 0)),
                      pl.BlockSpec(w_block, lambda i: (0, 0, 0))],
            out_specs=(pl.BlockSpec((1, E, tm), lambda i: (i, 0, 0)),
                       pl.BlockSpec((1, 2, E), lambda i: (i, 0, 0)))),
        compiler_params=pltpu.CompilerParams(
            dimension_semantics=("parallel",),      # no cross-step accumulator
            vmem_limit_bytes=vmem_limit),
    )(xt, w_s2d)

    # ---- tiny stats combine + BN fold (plain JAX; every tile has count tm) ----
    mu_t = stats[:, 0, :]                                   # (NT, E)
    sq_t = stats[:, 1, :]
    mean = jnp.mean(mu_t, axis=0)                           # (E,)
    var = (jnp.sum(sq_t, axis=0) / M
           + jnp.mean((mu_t - mean) ** 2, axis=0))          # Welford combine
    scale_v = gamma.astype(jnp.float32) / jnp.sqrt(var + eps)
    shift_v = beta.astype(jnp.float32) - mean * scale_v
    scale = scale_v.reshape(E, 1)
    shift = shift_v.reshape(E, 1)
    # conv bias `b` cancels: BN(conv + b) with batch stats == BN(conv).

    # ---- kernel 2: streaming BN affine + ReLU, lane-dense NCHW stores ----
    out3 = pl.pallas_call(
        _bn_relu_kernel,
        out_shape=jax.ShapeDtypeStruct((N, E, Ho * Wo), jnp.float32),
        grid_spec=pltpu.PrefetchScalarGridSpec(
            num_scalar_prefetch=0,
            grid=(NT,),
            in_specs=[pl.BlockSpec((1, E, tm), lambda i: (i, 0, 0)),
                      pl.BlockSpec((E, 1), lambda i: (0, 0)),
                      pl.BlockSpec((E, 1), lambda i: (0, 0))],
            out_specs=pl.BlockSpec((1, E, tm),
                                   lambda i: (i // n_t, 0, i % n_t))),
        compiler_params=pltpu.CompilerParams(
            dimension_semantics=("parallel",),
            vmem_limit_bytes=vmem_limit),
    )(y, scale, shift)

    return out3.reshape(N, E, Ho, Wo)


def reference(x, w, b, gamma, beta, *, stride, padding, eps=1e-5):
    y = jax.lax.conv_general_dilated(
        x, w, window_strides=stride,
        padding=[(padding[0], padding[0]), (padding[1], padding[1])],
        dimension_numbers=('NCHW', 'OIHW', 'NCHW'),
        precision=jax.lax.Precision.HIGHEST)
    y = y + b.reshape(1, -1, 1, 1)
    mean = jnp.mean(y, axis=(0, 2, 3), keepdims=True)
    var = jnp.mean((y - mean) ** 2, axis=(0, 2, 3), keepdims=True)
    y = (y - mean) / jnp.sqrt(var + eps)
    y = y * gamma.reshape(1, -1, 1, 1) + beta.reshape(1, -1, 1, 1)
    return jnp.maximum(y, 0.0)


if __name__ == "__main__":
    # batch=2, in_chans=4, spatial=16x16, embed_dim=32
    # overlapping patch embed: patch_size=4, stride=2, padding=1 -> 8x8 tokens
    N, C, H, W = 2, 4, 16, 16
    E = 32
    patch_size, stride, padding = (4, 4), (2, 2), (1, 1)

    key = jax.random.PRNGKey(0)
    kx, kw_, kb = jax.random.split(key, 3)
    x = jax.random.normal(kx, (N, C, H, W), dtype=jnp.float32)
    w = 0.02 * jax.random.normal(kw_, (E, C, patch_size[0], patch_size[1]),
                                 dtype=jnp.float32)        # Conv2d weight (OIHW)
    b = 0.01 * jax.random.normal(kb, (E,), dtype=jnp.float32)  # Conv2d bias
    gamma = jnp.ones((E,), dtype=jnp.float32)   # BatchNorm2d weight (PyTorch init)
    beta = jnp.zeros((E,), dtype=jnp.float32)   # BatchNorm2d bias  (PyTorch init)

    Ho = (H + 2 * padding[0] - patch_size[0]) // stride[0] + 1
    Wo = (W + 2 * padding[1] - patch_size[1]) // stride[1] + 1
    ref = reference(x, w, b, gamma, beta, stride=stride, padding=padding)

    # f32 end-to-end: tight numerical check of the fused conv/BN/ReLU math
    out_f32 = patch_embed_overlapping(x, w, b, gamma, beta,
                                      patch_size=patch_size, stride=stride,
                                      padding=padding,
                                      compute_dtype=jnp.float32,
                                      intermediate_dtype=jnp.float32)
    out_f32 = jax.block_until_ready(out_f32)
    assert out_f32.shape == (N, E, Ho, Wo)
    assert jnp.allclose(out_f32, ref, atol=1e-3, rtol=1e-3), \
        f"f32 max abs diff {jnp.max(jnp.abs(out_f32 - ref))}"

    # bf16 HBM path (default perf config): tolerance loosened only by the bf16
    # input/weight/intermediate rounding (stats and BN fold stay f32)
    out_bf16 = patch_embed_overlapping(x, w, b, gamma, beta,
                                       patch_size=patch_size, stride=stride,
                                       padding=padding)
    out_bf16 = jax.block_until_ready(out_bf16)
    assert out_bf16.shape == (N, E, Ho, Wo)
    assert jnp.allclose(out_bf16, ref, atol=5e-2, rtol=5e-2), \
        f"bf16 max abs diff {jnp.max(jnp.abs(out_bf16 - ref))}"

    print("KERNEL_OK")
</pallas_src>

<mosaic_0001>
module attributes {stable_mosaic.version = 11 : i64} {
  func.func @kernel(%arg0: i32, %arg1: memref<1x9x9x16xf32, #tpu.memory_space<vmem>>, %arg2: memref<4x16x32xf32, #tpu.memory_space<vmem>>, %arg3: memref<1x32x64xf32, #tpu.memory_space<vmem>>, %arg4: memref<1x2x32xf32, #tpu.memory_space<vmem>>) attributes {dimension_semantics = [#tpu.dimension_semantics<parallel>], iteration_bounds = array<i64: 2>, scalar_prefetch = 0 : i64, scratch_operands = 0 : i64, tpu.core_type = #tpu.core_type<tc>, window_params = [{transform_indices = @transform_0, window_bounds = array<i64: 1, 9, 9, 16>}, {pipeline_mode = #tpu.pipeline_mode<synchronous>, transform_indices = @transform_1, window_bounds = array<i64: 4, 16, 32>}, {transform_indices = @transform_2, window_bounds = array<i64: 1, 32, 64>}, {transform_indices = @transform_3, window_bounds = array<i64: 1, 2, 32>}]} {
    %cst = arith.constant 0.000000e+00 : f32
    %0 = vector.broadcast %cst : f32 to vector<64x32xf32>
    %c0 = arith.constant 0 : index
    %c0_0 = arith.constant 0 : index
    %c0_1 = arith.constant 0 : index
    %c0_2 = arith.constant 0 : index
    %1 = vector.load %arg1[%c0, %c0_0, %c0_1, %c0_2] : memref<1x9x9x16xf32, #tpu.memory_space<vmem>>, vector<1x8x8x16xf32>
    %2 = vector.shape_cast %1 : vector<1x8x8x16xf32> to vector<8x8x16xf32>
    %3 = vector.shape_cast %2 : vector<8x8x16xf32> to vector<64x16xf32>
    %c0_3 = arith.constant 0 : index
    %c0_4 = arith.constant 0 : index
    %c0_5 = arith.constant 0 : index
    %4 = vector.load %arg2[%c0_3, %c0_4, %c0_5] : memref<4x16x32xf32, #tpu.memory_space<vmem>>, vector<1x16x32xf32>
    %5 = vector.shape_cast %4 : vector<1x16x32xf32> to vector<16x32xf32>
    %cst_6 = arith.constant dense<0.000000e+00> : vector<64x32xf32>
    %6 = tpu.matmul %3, %5, %cst_6 {dimension_numbers = #tpu.dot_dimension_numbers<[1], [0], [0], [1], [0, 0, 1, 1], [], []>} : vector<64x16xf32>, vector<16x32xf32>, vector<64x32xf32> -> vector<64x32xf32>
    %7 = arith.addf %0, %6 : vector<64x32xf32>
    %c0_7 = arith.constant 0 : index
    %c0_8 = arith.constant 0 : index
    %c1 = arith.constant 1 : index
    %c0_9 = arith.constant 0 : index
    %8 = vector.load %arg1[%c0_7, %c0_8, %c1, %c0_9] : memref<1x9x9x16xf32, #tpu.memory_space<vmem>>, vector<1x8x8x16xf32>
    %9 = vector.shape_cast %8 : vector<1x8x8x16xf32> to vector<8x8x16xf32>
    %10 = vector.shape_cast %9 : vector<8x8x16xf32> to vector<64x16xf32>
    %c1_10 = arith.constant 1 : index
    %c0_11 = arith.constant 0 : index
    %c0_12 = arith.constant 0 : index
    %11 = vector.load %arg2[%c1_10, %c0_11, %c0_12] : memref<4x16x32xf32, #tpu.memory_space<vmem>>, vector<1x16x32xf32>
    %12 = vector.shape_cast %11 : vector<1x16x32xf32> to vector<16x32xf32>
    %cst_13 = arith.constant dense<0.000000e+00> : vector<64x32xf32>
    %13 = tpu.matmul %10, %12, %cst_13 {dimension_numbers = #tpu.dot_dimension_numbers<[1], [0], [0], [1], [0, 0, 1, 1], [], []>} : vector<64x16xf32>, vector<16x32xf32>, vector<64x32xf32> -> vector<64x32xf32>
    %14 = arith.addf %7, %13 : vector<64x32xf32>
    %c0_14 = arith.constant 0 : index
    %c1_15 = arith.constant 1 : index
    %c0_16 = arith.constant 0 : index
    %c0_17 = arith.constant 0 : index
    %15 = vector.load %arg1[%c0_14, %c1_15, %c0_16, %c0_17] : memref<1x9x9x16xf32, #tpu.memory_space<vmem>>, vector<1x8x8x16xf32>
    %16 = vector.shape_cast %15 : vector<1x8x8x16xf32> to vector<8x8x16xf32>
    %17 = vector.shape_cast %16 : vector<8x8x16xf32> to vector<64x16xf32>
    %c2 = arith.constant 2 : index
    %c0_18 = arith.constant 0 : index
    %c0_19 = arith.constant 0 : index
    %18 = vector.load %arg2[%c2, %c0_18, %c0_19] : memref<4x16x32xf32, #tpu.memory_space<vmem>>, vector<1x16x32xf32>
    %19 = vector.shape_cast %18 : vector<1x16x32xf32> to vector<16x32xf32>
    %cst_20 = arith.constant dense<0.000000e+00> : vector<64x32xf32>
    %20 = tpu.matmul %17, %19, %cst_20 {dimension_numbers = #tpu.dot_dimension_numbers<[1], [0], [0], [1], [0, 0, 1, 1], [], []>} : vector<64x16xf32>, vector<16x32xf32>, vector<64x32xf32> -> vector<64x32xf32>
    %21 = arith.addf %14, %20 : vector<64x32xf32>
    %c0_21 = arith.constant 0 : index
    %c1_22 = arith.constant 1 : index
    %c1_23 = arith.constant 1 : index
    %c0_24 = arith.constant 0 : index
    %22 = vector.load %arg1[%c0_21, %c1_22, %c1_23, %c0_24] : memref<1x9x9x16xf32, #tpu.memory_space<vmem>>, vector<1x8x8x16xf32>
    %23 = vector.shape_cast %22 : vector<1x8x8x16xf32> to vector<8x8x16xf32>
    %24 = vector.shape_cast %23 : vector<8x8x16xf32> to vector<64x16xf32>
    %c3 = arith.constant 3 : index
    %c0_25 = arith.constant 0 : index
    %c0_26 = arith.constant 0 : index
    %25 = vector.load %arg2[%c3, %c0_25, %c0_26] : memref<4x16x32xf32, #tpu.memory_space<vmem>>, vector<1x16x32xf32>
    %26 = vector.shape_cast %25 : vector<1x16x32xf32> to vector<16x32xf32>
    %cst_27 = arith.constant dense<0.000000e+00> : vector<64x32xf32>
    %27 = tpu.matmul %24, %26, %cst_27 {dimension_numbers = #tpu.dot_dimension_numbers<[1], [0], [0], [1], [0, 0, 1, 1], [], []>} : vector<64x16xf32>, vector<16x32xf32>, vector<64x32xf32> -> vector<64x32xf32>
    %28 = arith.addf %21, %27 : vector<64x32xf32>
    %cst_28 = arith.constant dense<0.000000e+00> : vector<32xf32>
    %29 = vector.multi_reduction <add>, %28, %cst_28 [0] : vector<64x32xf32> to vector<32xf32>
    %30 = vector.shape_cast %29 : vector<32xf32> to vector<1x32xf32>
    %cst_29 = arith.constant 6.400000e+01 : f32
    %31 = vector.broadcast %cst_29 : f32 to vector<1x32xf32>
    %32 = arith.divf %30, %31 : vector<1x32xf32>
    %33 = vector.broadcast %32 : vector<1x32xf32> to vector<64x32xf32>
    %34 = arith.subf %28, %33 : vector<64x32xf32>
    %35 = arith.mulf %34, %34 : vector<64x32xf32>
    %cst_30 = arith.constant dense<0.000000e+00> : vector<32xf32>
    %36 = vector.multi_reduction <add>, %35, %cst_30 [0] : vector<64x32xf32> to vector<32xf32>
    %37 = vector.shape_cast %36 : vector<32xf32> to vector<1x32xf32>
    %38 = tpu.concatenate %32, %37 in 0 : vector<1x32xf32>, vector<1x32xf32> -> vector<2x32xf32>
    %c0_31 = arith.constant 0 : index
    %c0_32 = arith.constant 0 : index
    %c0_33 = arith.constant 0 : index
    %39 = vector.load %arg4[%c0_31, %c0_32, %c0_33] : memref<1x2x32xf32, #tpu.memory_space<vmem>>, vector<1x2x32xf32>
    %40 = vector.shape_cast %39 : vector<1x2x32xf32> to vector<2x32xf32>
    %41 = vector.shape_cast %38 : vector<2x32xf32> to vector<1x2x32xf32>
    tpu.vector_store %arg4[%c0_31, %c0_32, %c0_33], %41 {strides = array<i32>} : memref<1x2x32xf32, #tpu.memory_space<vmem>>, vector<1x2x32xf32>,
    %42 = tpu.transpose %28, [1, 0] : vector<64x32xf32> -> vector<32x64xf32>
    %c0_34 = arith.constant 0 : index
    %c0_35 = arith.constant 0 : index
    %c0_36 = arith.constant 0 : index
    %43 = vector.load %arg3[%c0_34, %c0_35, %c0_36] : memref<1x32x64xf32, #tpu.memory_space<vmem>>, vector<1x32x64xf32>
    %44 = vector.shape_cast %43 : vector<1x32x64xf32> to vector<32x64xf32>
    %45 = vector.shape_cast %42 : vector<32x64xf32> to vector<1x32x64xf32>
    tpu.vector_store %arg3[%c0_34, %c0_35, %c0_36], %45 {strides = array<i32>} : memref<1x32x64xf32, #tpu.memory_space<vmem>>, vector<1x32x64xf32>,
    return
  }
  func.func @transform_0(%arg0: i32) -> (i32, i32, i32, i32) {
    %c0_i32 = arith.constant 0 : i32
    %c0_i32_0 = arith.constant 0 : i32
    %c0_i32_1 = arith.constant 0 : i32
    %c0_i32_2 = arith.constant 0 : i32
    return %arg0, %c0_i32, %c0_i32_0, %c0_i32_1 : i32, i32, i32, i32
  }
  func.func @transform_1(%arg0: i32) -> (i32, i32, i32) {
    %c0_i32 = arith.constant 0 : i32
    %c0_i32_0 = arith.constant 0 : i32
    %c0_i32_1 = arith.constant 0 : i32
    %c0_i32_2 = arith.constant 0 : i32
    return %c0_i32, %c0_i32_0, %c0_i32_1 : i32, i32, i32
  }
  func.func @transform_2(%arg0: i32) -> (i32, i32, i32) {
    %c0_i32 = arith.constant 0 : i32
    %c0_i32_0 = arith.constant 0 : i32
    %c0_i32_1 = arith.constant 0 : i32
    return %arg0, %c0_i32, %c0_i32_0 : i32, i32, i32
  }
  func.func @transform_3(%arg0: i32) -> (i32, i32, i32) {
    %c0_i32 = arith.constant 0 : i32
    %c0_i32_0 = arith.constant 0 : i32
    %c0_i32_1 = arith.constant 0 : i32
    return %arg0, %c0_i32, %c0_i32_0 : i32, i32, i32
  }
}

</mosaic_0001>

<bundles_post_ra>
// kernel: tpu_custom_call.1
= control target key start
LH: loop header
LB: loop body
LE: loop exit
PB: predicated region body
PF: predicated region fallthrough
CT: control target
= control target key end

     0   :  { %9 = vsyncpa [#allocation3], 0  ;;  %s1595_s0 = inlined_call_operand.vmem [shape: f32[2,9,9,16], index: 0, kind: input, shape index: {}]   ;;  %s1596_s1 = inlined_call_operand.vmem [shape: f32[4,16,32], index: 1, kind: input, shape index: {}]   ;;  %s1597_s2 = inlined_call_operand.hbm [shape: f32[2,32,64], index: 2, kind: output, shape index: {0}]   ;;  %s1598_s3 = inlined_call_operand.hbm [shape: f32[2,2,32], index: 3, kind: output, shape index: {1}]  }
   0x1   :  { %11 = vsyncpa [#allocation3 + $0x1], 0 }
   0x2   :  { %12 = vsyncpa [#allocation5], 0 }
   0x3   :  { %14 = vsyncpa [#allocation5 + $0x1], 0  ;;  %s1366_s12 = smov 0   ;;  %s1368_s13 = smov 0  }
   0x4   :  { %s1370_s14 = smov 0   ;;  %s1372_s15 = smov 0  }
   0x5 LB: > { %s1387_s16 = sadd.s32 4294967295, %s1340_s15   ;;  %s985_s17 = sadd.s32 4294967294, %s1340_s15   ;;  %s1340_s15 = sphi %s1372_s15, %s1604_s15   ;;  %s1336_s14 = sphi %s1370_s14, %s1603_s14   ;;  %s1332_s13 = sphi %s1368_s13, %s1602_s13   ;;  %s1328_s12 = sphi %s1366_s12, %s1601_s12  }
   0x6   : > { %s1391_s18 = sadd.s32 1, %s1340_s15   ;;  %s74_s19 = sadd.s32 1, %s1336_s14 }
   0x7   : > { %s71_s20 = ssub.s32 %s1340_s15, %s1391_s18  ;;  %p84_p0 = scmp.ne.s32.totalorder %s1336_s14, %s1332_s13 }
   0x8   : > { %p72_p1 = scmp.eq.s32.totalorder %s71_s20, 0  ;;  %p85_p2 = scmp.eq.s32.totalorder %s1387_s16, 1 }
   0x9   : > { %p90_p3 = scmp.ne.s32.totalorder %s1332_s13, %s1328_s12  ;;  %p91_p4 = scmp.eq.s32.totalorder %s985_s17, 1 }
   0xa   : > { %s1402_s21 = scalar_select %p72_p1, %s1336_s14, %s74_s19  }
   0xb   : > { %p1404_p5 = por %p85_p2, %p84_p0  ;;  %p1408_p6 = por %p91_p4, %p90_p3 }
   0xc   : > { %p988_p7 = scmp.ge.s32.totalorder %s1340_s15, 1  ;;  %p146_p8 = scmp.lt.s32.totalorder %s1340_s15, 3 }
   0xe   : > { %p147_p9 = pnand %p988_p7, %p146_p8 }
   0xf   : > { %v992_v0 = vld [vmem:[%s1596_s1 + $0x10] sm:$0xff] (!%p147_p9)  ;;  %v993_v1 = vld [vmem:[%s1596_s1 + $0x18] sm:$0xff] (!%p147_p9)  ;;  %v1018_v2 = vld [vmem:[%s1596_s1 + $0x20] sm:$0xff] (!%p147_p9)  ;;  %p175_p10 = scmp.lt.s32.totalorder (!%p147_p9), %s1387_s16, 1  ;;  %vm201_vm0 = vcmask (!%p147_p9), 130048   ;;  %vm757_vm1 = vcmask (!%p147_p9), 261120  }
  0x10   : > { %150 = sbr.rel (%p147_p9) target bundleno = 417 (0x1a1), region = 28  ;;  %v1158_v3 = vpack.c.bf16 (!%p147_p9), %v993_v1, %v992_v0  ;;  %v1019_v4 = vld [vmem:[%s1596_s1 + $0x28] sm:$0xff] (!%p147_p9)  ;;  %v188_v5 = vld [vmem:[%s1596_s1] sm:$0xff] (!%p147_p9)  ;;  %v1036_v9 = vld [vmem:[%s1596_s1 + $0x30] sm:$0xff] (!%p147_p9)  ;;  %s1512_s27 = sand.u32 (!%p147_p9), 1, %s1332_s13   ;;  %vm818_vm2 = vcmask (!%p147_p9), 1040384  }
  0x11   : > { %v189_v6 = vld [vmem:[%s1596_s1 + $0x8] sm:$0xff] (!%p147_p9)  ;;  %v1166_v7 = vpack.c.bf16 (!%p147_p9), %v1019_v4, %v1018_v2  ;;  %v1037_v10 = vld [vmem:[%s1596_s1 + $0x38] sm:$0xff] (!%p147_p9)  ;;  %s990_s28 = sshll.u32 (!%p147_p9), %s1512_s27, 1  ;;  %s1050_s29 = sshll.u32 (!%p147_p9), %s1387_s16, 5  ;;  %vm820_vm3 = vcmask (!%p147_p9), 254976  }
  0x12   : > { %v1162_v8 = vpack.c.bf16 (!%p147_p9), %v189_v6, %v188_v5  ;;  %1159 = vmatprep.subr.bf16.mxu1 (!%p147_p9), %v1158_v3  ;;  %v1170_v11 = vpack.c.bf16 (!%p147_p9), %v1037_v10, %v1036_v9  ;;  %s174_s30 = scalar_lea.vmem (!%p147_p9), [#allocation4], %s990_s28  ;;  %s1519_s7 = scalar_lea.hbm (!%p147_p9), %s1598_s3, %s1050_s29 }
  0x13   : > { %1167 = vmatprep.subr.bf16.mxu0 (!%p147_p9), %v1166_v7  ;;  %1161 = vmatpush3.bf16.msra.mxu1 (!%p147_p9), %v1158_v3  ;;  %s894_s4 = sshll.u32 (!%p147_p9), %s174_s30, 4  ;;  %s865_s8 = scalar_lea.sflag (!%p147_p9), [#allocation5], %s1512_s27  ;;  %s1521_s4 = int_to_ptr.vmem [resolvable:$true] %s894_s4 }
  0x14   : > { %1169 = vmatpush3.bf16.msra.mxu0 (!%p147_p9), %v1166_v7  ;;  %1163 = vmatprep.subr.bf16.mxu1 (!%p147_p9), %v1162_v8  ;;  %s1342_s10 = smov (!%p147_p9), [#allocation4]  }
  0x15   : > { %1171 = vmatprep.subr.bf16.mxu0 (!%p147_p9), %v1170_v11  ;;  %s1250_s11 = sshll.u32 (!%p147_p9), %s1342_s10, 4  ;;  %s1251_s11 = int_to_ptr.vmem [resolvable:$false] %s1250_s11 }
  0x16   : > { %s1252_s17 = scalar_lea.vmem (!%p147_p9), %s1251_s11, 64  ;;  %p1253_p0 = scmp.lt.s32.totalorder (!%p147_p9), %s1521_s4, %s1251_s11 }
  0x17   : > { %s176_s9 = scalar_select %p175_p10, %s1387_s16, 1 }
  0x19   : > { %s1198_s20 = smul.u32 144, %s176_s9  ;;  %s1246_s9 = scalar_lea.vmem %s1521_s4, 32 }
  0x1a   : > { %p1247_p11 = scmp.ne.s32.totalorder %s1521_s4, %s1246_s9  ;;  %p1254_p1 = scmp.lt.s32.totalorder %s1252_s17, %s1246_s9 }
  0x1b   : > { %s1443_s26 = scalar_lea.vmem %s1595_s0, %s1198_s20 }
  0x1c   : > { %v190_v12 = vld [vmem:[%s1443_s26 + $0x1] sm:$0xff]  ;;  %v1010_v13 = vld [vmem:[%s1443_s26 + $0x10] sm:$0xff]  ;;  %p1248_p12 = pnand %p1247_p11, %p1404_p5  ;;  %p1255_p2 = por %p1254_p1, %p1253_p0 }
  0x1d   : > { %v191_v14 = vld [vmem:[%s1443_s26 + $0x11] sm:$0xff]  ;;  %1098 = vmatprep.mubr.msk.f32.mxu1 %vm201_vm0, %v190_v12  ;;  %1130 = vmatprep.mubr.msk.f32.mxu0 %vm201_vm0, %v1010_v13  ;;  %v1011_v15 = vld [vmem:[%s1443_s26 + $0x20] sm:$0xff] }
  0x1e   : > { %v192_v16 = vld [vmem:[%s1443_s26 + $0x21] sm:$0xff]  ;;  %v1012_v17 = vld [vmem:[%s1443_s26 + $0x30] sm:$0xff]  ;;  %1099 = vmatmul.mubr.msk.f32.vlgmr.msra.gmra.mrb[0].mxu1 %vm201_vm0, %v191_v14  ;;  %1131 = vmatmul.mubr.msk.f32.vlgmr.msra.gmra.mrb[0].mxu0 %vm201_vm0, %v1011_v15  ;;  %p1249_p13 = pneg %p1248_p12 }
  0x1f   : > { %1165 = vmatpush3.bf16.msra.mxu1 %v1162_v8  ;;  %1173 = vmatpush3.bf16.msra.mxu0 %v1170_v11  ;;  %v193_v18 = vld [vmem:[%s1443_s26 + $0x31] sm:$0xff]  ;;  %v1013_v19 = vld [vmem:[%s1443_s26 + $0x40] sm:$0xff] }
  0x20   : > { %1101 = vmatprep.mubr.msk.f32.mxu1 %vm201_vm0, %v192_v16  ;;  %1133 = vmatprep.mubr.msk.f32.mxu0 %vm201_vm0, %v1012_v17  ;;  %v194_v20 = vld [vmem:[%s1443_s26 + $0x41] sm:$0xff]  ;;  %v1014_v21 = vld [vmem:[%s1443_s26 + $0x50] sm:$0xff]  ;;  %p1256_p3 = pnand %p1255_p2, %p1249_p13 }
  0x21   : > { %v195_v22 = vld [vmem:[%s1443_s26 + $0x51] sm:$0xff]  ;;  %v1015_v23 = vld [vmem:[%s1443_s26 + $0x60] sm:$0xff] }
  0x22   : > { %1102 = vmatmul.mubr.msk.f32.gmra.mrb[2].mxu1 %vm201_vm0, %v193_v18  ;;  %1134 = vmatmul.mubr.msk.f32.gmra.mrb[2].mxu0 %vm201_vm0, %v1013_v19  ;;  %v196_v24 = vld [vmem:[%s1443_s26 + $0x61] sm:$0xff]  ;;  %v1016_v25 = vld [vmem:[%s1443_s26 + $0x70] sm:$0xff] }
  0x23   : > { %1104 = vmatprep.mubr.msk.f32.mxu1 %vm201_vm0, %v194_v20  ;;  %1136 = vmatprep.mubr.msk.f32.mxu0 %vm201_vm0, %v1014_v21  ;;  %v197_v26 = vld [vmem:[%s1443_s26 + $0x71] sm:$0xff]  ;;  %v1017_v27 = vld [vmem:[%s1443_s26 + $0x80] sm:$0xff] }
  0x24   : > { %v180_v28 = vld [vmem:[%s1443_s26] sm:$0xff] }
  0x25   : > { %v1035_v29 = vld [vmem:[%s1443_s26 + $0x81] sm:$0xff] }
  0x26   : > { %1105 = vmatmul.mubr.msk.f32.gmra.mrb[4].mxu1 %vm201_vm0, %v195_v22  ;;  %1137 = vmatmul.mubr.msk.f32.gmra.mrb[4].mxu0 %vm201_vm0, %v1015_v23 }
  0x27   : > { %1107 = vmatprep.mubr.msk.f32.mxu1 %vm201_vm0, %v196_v24  ;;  %1139 = vmatprep.mubr.msk.f32.mxu0 %vm201_vm0, %v1016_v25 }
  0x2a   : > { %1108 = vmatmul.mubr.msk.f32.gmra.mrb[6].mxu1 %vm201_vm0, %v197_v26  ;;  %1140 = vmatmul.mubr.msk.f32.gmra.mrb[6].mxu0 %vm201_vm0, %v1017_v27 }
  0x2b   : > { %1114 = vmatprep.mubr.msk.f32.mxu1 %vm201_vm0, %v180_v28  ;;  %1146 = vmatprep.mubr.msk.f32.mxu0 %vm201_vm0, %v191_v14 }
  0x2e   : > { %1115 = vmatmul.mubr.msk.f32.vlgmr.msra.gmra.mrb[0].mxu1 %vm201_vm0, %v1010_v13  ;;  %1147 = vmatmul.mubr.msk.f32.vlgmr.msra.gmra.mrb[0].mxu0 %vm201_vm0, %v192_v16 }
  0x2f   : > { %1117 = vmatprep.mubr.msk.f32.mxu1 %vm201_vm0, %v1011_v15  ;;  %1149 = vmatprep.mubr.msk.f32.mxu0 %vm201_vm0, %v193_v18 }
  0x32   : > { %1118 = vmatmul.mubr.msk.f32.gmra.mrb[2].mxu1 %vm201_vm0, %v1012_v17  ;;  %1150 = vmatmul.mubr.msk.f32.gmra.mrb[2].mxu0 %vm201_vm0, %v194_v20 }
  0x33   : > { %1120 = vmatprep.mubr.msk.f32.mxu1 %vm201_vm0, %v1013_v19  ;;  %1152 = vmatprep.mubr.msk.f32.mxu0 %vm201_vm0, %v195_v22 }
  0x36   : > { %1121 = vmatmul.mubr.msk.f32.gmra.mrb[4].mxu1 %vm201_vm0, %v1014_v21  ;;  %1153 = vmatmul.mubr.msk.f32.gmra.mrb[4].mxu0 %vm201_vm0, %v196_v24 }
  0x37   : > { %1123 = vmatprep.mubr.msk.f32.mxu1 %vm201_vm0, %v1015_v23  ;;  %1155 = vmatprep.mubr.msk.f32.mxu0 %vm201_vm0, %v197_v26 }
  0x3a   : > { %1124 = vmatmul.mubr.msk.f32.gmra.mrb[6].mxu1 %vm201_vm0, %v1016_v25  ;;  %1156 = vmatmul.mubr.msk.f32.gmra.mrb[6].mxu0 %vm201_vm0, %v1035_v29 }
 0x101   : > { %v1116_v30 = vpop.f32.mrb[0].mxu1  ;;  %v1148_v31 = vpop.f32.mrb[0].mxu0 }
 0x102   : > { %v1174_v32 = vadd.f32 %v1148_v31, %v1116_v30  ;;  %v421_v33 = vpop.f32.mrb[1].mxu1  ;;  %v710_v34 = vpop.f32.mrb[1].mxu0 }
 0x103   : > { %v1175_v35 = vadd.f32 %v710_v34, %v421_v33 }
 0x104   : > { %v759_v36 = vsel %vm757_vm1, %v1174_v32, 0.0 }
 0x105   : > { %v758_v37 = vsel %vm757_vm1, %v1175_v35, 0.0  ;;  %v1151_v38 = vpop.f32.mrb[2].mxu0  ;;  %822 = vxpose.xlu0.b32.start [1/8] (short) (narrow) %v1175_v35, 32  ;;  %v1119_v39 = vpop.f32.mrb[2].mxu1 }
 0x106   : > { %v760_v40 = vadd.f32 %v759_v36, %v758_v37  ;;  %v1176_v41 = vadd.f32 %v1151_v38, %v1119_v39  ;;  %v431_v42 = vpop.f32.mrb[3].mxu1  ;;  %v720_v43 = vpop.f32.mrb[3].mxu0 }
 0x107   : > { %v1177_v44 = vadd.f32 %v720_v43, %v431_v42 }
 0x108   : > { %v763_v52 = vsel %vm757_vm1, %v1176_v41, 0.0 }
 0x109   : > { %v761_v45 = vsel %vm757_vm1, %v1177_v44, 0.0  ;;  %v1154_v46 = vpop.f32.mrb[4].mxu0  ;;  %823 = vxpose.xlu0.b32.cont [2/8] (short) (narrow) %v1174_v32, 32  ;;  %v1122_v47 = vpop.f32.mrb[4].mxu1 }
 0x10a   : > { %v762_v48 = vadd.f32 %v761_v45, %v760_v40  ;;  %v1178_v49 = vadd.f32 %v1154_v46, %v1122_v47  ;;  %v441_v50 = vpop.f32.mrb[5].mxu1  ;;  %v730_v51 = vpop.f32.mrb[5].mxu0 }
 0x10b   : > { %v1179_v53 = vadd.f32 %v730_v51, %v441_v50 }
 0x10c   : > { %v764_v54 = vadd.f32 %v763_v52, %v762_v48  ;;  %v767_v62 = vsel %vm757_vm1, %v1178_v49, 0.0 }
 0x10d   : > { %v765_v55 = vsel %vm757_vm1, %v1179_v53, 0.0  ;;  %v1157_v56 = vpop.f32.mrb[6].mxu0  ;;  %824 = vxpose.xlu0.b32.cont [3/8] (short) (narrow) %v1177_v44, 32  ;;  %v1125_v57 = vpop.f32.mrb[6].mxu1 }
 0x10e   : > { %v766_v58 = vadd.f32 %v765_v55, %v764_v54  ;;  %v1180_v59 = vadd.f32 %v1157_v56, %v1125_v57  ;;  %v451_v60 = vpop.f32.mrb[7].mxu1  ;;  %v740_v61 = vpop.f32.mrb[7].mxu0 }
 0x10f   : > { %v1181_v63 = vadd.f32 %v740_v61, %v451_v60 }
 0x110   : > { %v768_v0 = vadd.f32 %v767_v62, %v766_v58  ;;  %v771_v3 = vsel %vm757_vm1, %v1180_v59, 0.0 }
 0x111   : > { %v769_v1 = vsel %vm757_vm1, %v1181_v63, 0.0  ;;  %825 = vxpose.xlu0.b32.cont [4/8] (short) (narrow) %v1176_v41, 32 }
 0x112   : > { %v770_v2 = vadd.f32 %v769_v1, %v768_v0 }
 0x114   : > { %v772_v4 = vadd.f32 %v771_v3, %v770_v2 }
 0x115   : > { %826 = vxpose.xlu0.b32.cont [5/8] (short) (narrow) %v1179_v53, 32 }
 0x116   : > { %v773_v5 = vrot.slane %v772_v4, 4 }
 0x118   : > { %v774_v6 = vadd.f32 %v773_v5, %v772_v4 }
 0x119   : > { %827 = vxpose.xlu0.b32.cont [6/8] (short) (narrow) %v1178_v49, 32 }
 0x11a   : > { %v775_v7 = vrot.slane %v774_v6, 2 }
 0x11c   : > { %v776_v8 = vadd.f32 %v775_v7, %v774_v6 }
 0x11d   : > { %828 = vxpose.xlu0.b32.cont [7/8] (short) (narrow) %v1181_v63, 32 }
 0x11e   : > { %v777_v9 = vrot.slane %v776_v8, 1 }
 0x120   : > { %v778_v10 = vadd.f32 %v777_v9, %v776_v8 }
 0x121   : > { %829 = vxpose.xlu0.b32.end [8/8] (short) (narrow) %v1180_v59, 32 }
 0x122   : > { %v780_v11 = vmul.f32 0.015625, %v778_v10 }
 0x124   : > { %v781_v12 = vsub.f32 %v1175_v35, %v780_v11  ;;  %v782_v13 = vsub.f32 %v1174_v32, %v780_v11  ;;  %v783_v14 = vsub.f32 %v1177_v44, %v780_v11  ;;  %v784_v15 = vsub.f32 %v1176_v41, %v780_v11 }
 0x125   : > { %v785_v16 = vsub.f32 %v1179_v53, %v780_v11  ;;  %v786_v17 = vsub.f32 %v1178_v49, %v780_v11  ;;  %v787_v18 = vsub.f32 %v1181_v63, %v780_v11  ;;  %v788_v19 = vsub.f32 %v1180_v59, %v780_v11 }
 0x126   : > { %v789_v20 = vmul.f32 %v781_v12, %v781_v12  ;;  %v790_v21 = vmul.f32 %v782_v13, %v782_v13  ;;  %v791_v22 = vmul.f32 %v783_v14, %v783_v14  ;;  %v792_v23 = vmul.f32 %v784_v15, %v784_v15 }
 0x127   : > { %v793_v27 = vmul.f32 %v785_v16, %v785_v16  ;;  %v794_v30 = vmul.f32 %v786_v17, %v786_v17  ;;  %v795_v33 = vmul.f32 %v787_v18, %v787_v18  ;;  %v796_v36 = vmul.f32 %v788_v19, %v788_v19 }
 0x128   : > { %v797_v24 = vsel %vm757_vm1, %v789_v20, 0.0  ;;  %v798_v25 = vsel %vm757_vm1, %v790_v21, 0.0  ;;  %v800_v28 = vsel %vm757_vm1, %v791_v22, 0.0  ;;  %v802_v31 = vsel %vm757_vm1, %v792_v23, 0.0 }
 0x129   : > { %v799_v26 = vadd.f32 %v798_v25, %v797_v24  ;;  %v804_v34 = vsel %vm757_vm1, %v793_v27, 0.0  ;;  %v806_v37 = vsel %vm757_vm1, %v794_v30, 0.0  ;;  %v808_v39 = vsel %vm757_vm1, %v795_v33, 0.0 }
 0x12a   : > { %v810_v41 = vsel %vm757_vm1, %v796_v36, 0.0 }
 0x12b   : > { %v801_v29 = vadd.f32 %v800_v28, %v799_v26 }
 0x12d   : > { %v803_v32 = vadd.f32 %v802_v31, %v801_v29 }
 0x12f   : > { %v805_v35 = vadd.f32 %v804_v34, %v803_v32 }
 0x131   : > { %v807_v38 = vadd.f32 %v806_v37, %v805_v35 }
 0x133   : > { %v809_v40 = vadd.f32 %v808_v39, %v807_v38 }
 0x135   : > { %v811_v42 = vadd.f32 %v810_v41, %v809_v40 }
 0x137   : > { %v812_v43 = vrot.slane %v811_v42, 4 }
 0x139   : > { %v813_v44 = vadd.f32 %v812_v43, %v811_v42 }
 0x13b   : > { %v814_v45 = vrot.slane %v813_v44, 2 }
 0x13d   : > { %v815_v46 = vadd.f32 %v814_v45, %v813_v44 }
 0x13f   : > { %v816_v47 = vrot.slane %v815_v46, 1 }
 0x141   : > { %v817_v48 = vadd.f32 %v816_v47, %v815_v46 }
 0x143   : > { %v819_v49 = vsel %vm818_vm2, %v780_v11, %v817_v48 }
 0x144   : > { %821 = vst.msk [vmem:[%s174_s30] sm:$0x3] %vm820_vm3, %v819_v49 }
 0x145   : > { %1259 = shalt.err (!%p1256_p3)
}
 0x146   : > { %s1260_s19 = scalar_lea.hbm %s1519_s7, 32  ;;  %s1264_s25 = scalar_lea.hbm %s1598_s3, 64 }
 0x147   : > { %p1261_p4 = scmp.ne.s32.totalorder %s1519_s7, %s1260_s19  ;;  %p1265_p9 = scmp.lt.u32.totalorder %s1519_s7, %s1598_s3 }
 0x148   : > { %p1266_p10 = scmp.lt.u32.totalorder %s1264_s25, %s1260_s19  ;;  %p1268_p12 = scmp.lt.u32.totalorder %s1260_s19, %s1519_s7 }
 0x149   : > { %p1262_p7 = pnand %p1261_p4, %p1404_p5 }
 0x14a   : > { %p1267_p11 = por %p1266_p10, %p1265_p9 }
 0x14b   : > { %p1263_p8 = pneg %p1262_p7 }
 0x14c   : > { %p1269_p13 = por %p1268_p12, %p1267_p11 }
 0x14e   : > { %p1270_p0 = pnand %p1269_p13, %p1263_p8 }
 0x150   : > { %1273 = shalt.err (!%p1270_p0)
}
 0x151   : > { %1200 = dma.vmem_to_hbm [thread:$0]  (%p1404_p5), %s1521_s4, 32, %s1519_s7, %s865_s8   ;;  %vm854_vm4 = vcmask 523264  }
 0x152   : > { %s989_s29 = sshll.u32 %s1512_s27, 5  ;;  %s1053_s6 = sshll.u32 %s1387_s16, 9 }
 0x153   : > { %s167_s30 = scalar_lea.vmem [#allocation2], %s989_s29  ;;  %s1552_s4 = scalar_lea.hbm %s1597_s2, %s1053_s6 }
 0x154   : > { %s878_s5 = sshll.u32 %s167_s30, 4  ;;  %s860_s7 = scalar_lea.sflag [#allocation3], %s1512_s27  ;;  %s1547_s5 = int_to_ptr.vmem [resolvable:$true] %s878_s5 }
 0x155   : > { %s1274_s8 = scalar_lea.vmem %s1547_s5, 512  ;;  %s1343_s16 = smov [#allocation2]  }
 0x156   : > { %p1275_p1 = scmp.ne.s32.totalorder %s1547_s5, %s1274_s8  ;;  %s1278_s11 = sshll.u32 %s1343_s16, 4  ;;  %s1279_s11 = int_to_ptr.vmem [resolvable:$false] %s1278_s11 }
 0x157   : > { %s1280_s17 = scalar_lea.vmem %s1279_s11, 1024  ;;  %p1281_p4 = scmp.lt.s32.totalorder %s1547_s5, %s1279_s11 }
 0x158   : > { %p1276_p2 = pnand %p1275_p1, %p1404_p5  ;;  %p1282_p7 = scmp.lt.s32.totalorder %s1280_s17, %s1274_s8 }
 0x15a   : > { %p1277_p3 = pneg %p1276_p2  ;;  %p1283_p8 = por %p1282_p7, %p1281_p4 }
 0x15c   : > { %p1284_p9 = pnand %p1283_p8, %p1277_p3 }
 0x185   : > { %v838_v50 = vpop.trf.xlu0 }
 0x186   : > { %855 = vst.msk [vmem:[%s167_s30] sm:$0xff] %vm854_vm4, %v838_v50 }
 0x189   : > { %v839_v51 = vpop.trf.xlu0 }
 0x18a   : > { %856 = vst.msk [vmem:[%s167_s30 + $0x8] sm:$0xff] %vm854_vm4, %v839_v51 }
 0x18d   : > { %v840_v52 = vpop.trf.xlu0 }
 0x18e   : > { %857 = vst.msk [vmem:[%s167_s30 + $0x10] sm:$0xff] %vm854_vm4, %v840_v52 }
 0x191   : > { %v841_v53 = vpop.trf.xlu0 }
 0x192   : > { %858 = vst.msk [vmem:[%s167_s30 + $0x18] sm:$0xff] %vm854_vm4, %v841_v53 }
 0x193   : > { %1287 = shalt.err (!%p1284_p9)
}
 0x194   : > { %s1288_s19 = scalar_lea.hbm %s1552_s4, 512  ;;  %s1292_s25 = scalar_lea.hbm %s1597_s2, 1024 }
 0x195   : > { %p1289_p10 = scmp.ne.s32.totalorder %s1552_s4, %s1288_s19  ;;  %p1293_p13 = scmp.lt.u32.totalorder %s1552_s4, %s1597_s2 }
 0x196   : > { %p1294_p0 = scmp.lt.u32.totalorder %s1292_s25, %s1288_s19  ;;  %p1296_p2 = scmp.lt.u32.totalorder %s1288_s19, %s1552_s4 }
 0x197   : > { %p1290_p11 = pnand %p1289_p10, %p1404_p5 }
 0x198   : > { %p1295_p1 = por %p1294_p0, %p1293_p13 }
 0x199   : > { %p1291_p12 = pneg %p1290_p11 }
 0x19a   : > { %p1297_p3 = por %p1296_p2, %p1295_p1 }
 0x19c   : > { %p1298_p4 = pnand %p1297_p3, %p1291_p12 }
 0x19e   : > { %1301 = shalt.err (!%p1298_p4)
}
 0x19f   : > { %s1344_s29 = smov 128   ;;  %s1345_s30 = smov 8  }
 0x1a0   : > { %1199 = dma.vmem_to_hbm [thread:$0]  (%p1404_p5), %s1547_s5, 512, %s1552_s4, %s860_s7, %s1344_s29, %s1344_s29, %s1345_s30  }
 0x1a1 PF: > { %p1210_p7 = scmp.ge.s32.totalorder %s1340_s15, 2  ;;  %s906_s6 = sand.u32 1, %s1328_s12  }
 0x1a2   : > { %s907_s9 = scalar_lea.sflag [#allocation3], %s906_s6 }
 0x1a3   : > { %p1204_p8 = pnand %p1210_p7, %p1408_p6 }
 0x1a5   : > { %1319 = dma.done.wait (!%p1204_p8), %s907_s9, 512  }
 0x1a6   : > { %1321 = vsyncadd (!%p1204_p8), %s907_s9, 4294966784  ;;  %s916_s10 = scalar_lea.sflag [#allocation5], %s906_s6 }
 0x1a7   : > { %1323 = dma.done.wait (!%p1204_p8), %s916_s10, 32  }
 0x1a8   : > { %1325 = vsyncadd (!%p1204_p8), %s916_s10, 4294967264  ;;  %p17_p5 = scmp.ge.s32.totalorder %s1391_s18, 4   ;;  %s1601_s12 = smov %s1332_s13 }
 0x1a9   : > { %s1602_s13 = smov %s1336_s14  ;;  %s1603_s14 = smov %s1402_s21 }
 0x1aa   : > { %s1604_s15 = smov %s1391_s18  ;;  %19 = sbr.rel (!%p17_p5) target bundleno = 5 (0x5), region = 84 }
 0x1b1   :  { %921 = vsyncpa [#allocation3], 1 }
 0x1b2   :  { %923 = vsyncpa [#allocation3 + $0x1], 1 }
 0x1b3   :  { %924 = vsyncpa [#allocation5], 1 }
 0x1b4   :  { %926 = vsyncpa [#allocation5 + $0x1], 1 }

</bundles_post_ra>
